<compile_context>
chip_gen: v7x
topology: tpu7x:2x2x1
jax: 0.10.0
libtpu: 0.0.40
codegen_flags: <defaults>
</compile_context>

<pallas_src>
import functools

import jax
import jax.numpy as jnp
from jax.experimental import pallas as pl
from jax.experimental.pallas import tpu as pltpu

_LANE = 128
_SUBLANE = 8
_TARGET_BLOCK_BYTES = 2 * 1024 * 1024   # per-input, per-buffer VMEM target
_MAX_ROW_TILE = 4096                    # 4 buffers + scratch stay well under 32 MiB
_VMEM_LIMIT_BYTES = 32 * 1024 * 1024    # <= physical VMEM on v5e/v6e/v7x


def _cdiv(a, b):
    return -(-a // b)


def _round_up(x, m):
    return _cdiv(x, m) * m


def _fpfn_kernel(out_ref, tgt_ref, loss_ref, so_ref, st_ref, sot_ref,
                 *, n_total, n_tile, mask_n, row_tile):
    # out_ref / tgt_ref: (row_tile, n_tile) VMEM tiles (original dtype)
    # loss_ref:          (1, 1, row_tile) VMEM tile (lane-dense per-row loss)
    # so/st/sot_ref:     (row_tile, 1) f32 accumulators (persist across k axis)
    k = pl.program_id(1)

    @pl.when(k == 0)
    def _init():
        so_ref[...] = jnp.zeros_like(so_ref)
        st_ref[...] = jnp.zeros_like(st_ref)
        sot_ref[...] = jnp.zeros_like(sot_ref)

    o = out_ref[...].astype(jnp.float32)
    t = tgt_ref[...].astype(jnp.float32)

    if mask_n:
        # Ragged tail of the reduction axis: zero out the out-of-bounds lanes.
        col = jax.lax.broadcasted_iota(jnp.int32, o.shape, 1) + k * n_tile
        valid = col < n_total
        o = jnp.where(valid, o, 0.0)
        t = jnp.where(valid, t, 0.0)

    so_ref[...] += jnp.sum(o, axis=-1, keepdims=True)
    st_ref[...] += jnp.sum(t, axis=-1, keepdims=True)
    sot_ref[...] += jnp.sum(o * t, axis=-1, keepdims=True)

    @pl.when(k == pl.num_programs(1) - 1)
    def _finalize():
        s_o = so_ref[...]
        s_t = st_ref[...]
        s_ot = sot_ref[...]
        sum1 = s_t                               # sum(target)
        sum2 = jnp.float32(n_total) - s_t        # sum(1 - target)
        fp = (s_o - s_ot) / (sum2 + 1e-6)        # sum(output * (1 - target)) / (sum2 + eps)
        fn = (s_t - s_ot) / (sum1 + 1e-6)        # sum((1 - output) * target) / (sum1 + eps)
        loss = jnp.minimum(fp, 100.0) + jnp.minimum(fn, 100.0)   # (row_tile, 1)
        # Lane-dense store: rows mapped onto lanes of the output row block.
        loss_ref[...] = loss.reshape(1, 1, row_tile)


@jax.jit
def fpfn_loss(output, target):
    assert output.shape == target.shape
    *lead, n = output.shape
    rows = 1
    for d in lead:
        rows *= d

    # Keep the original dtypes; the kernel casts to f32 internally.
    out2d = output.reshape(rows, n)
    tgt2d = target.reshape(rows, n)

    itemsize = max(out2d.dtype.itemsize, tgt2d.dtype.itemsize)
    bytes_per_row = _round_up(n, _LANE) * itemsize   # account for lane padding

    if _SUBLANE * bytes_per_row <= _TARGET_BLOCK_BYTES:
        # Common case: full reduction axis in one block, tile the rows.
        n_tile = n
        if rows < _SUBLANE:
            row_tile = rows
        else:
            budget_rows = (_TARGET_BLOCK_BYTES // bytes_per_row) // _SUBLANE * _SUBLANE
            row_tile = max(_SUBLANE,
                           min(_MAX_ROW_TILE, _round_up(rows, _SUBLANE), budget_rows))
    else:
        # Huge reduction axis: tile N as well and accumulate partial sums.
        row_tile = rows if rows < _SUBLANE else _SUBLANE
        n_tile = (_TARGET_BLOCK_BYTES // (_SUBLANE * itemsize)) // _LANE * _LANE
        n_tile = max(_LANE, min(n_tile, _round_up(n, _LANE)))

    num_row_tiles = _cdiv(rows, row_tile)
    n_tiles = _cdiv(n, n_tile)
    mask_n = (n % n_tile) != 0

    kernel = functools.partial(_fpfn_kernel, n_total=n, n_tile=n_tile,
                               mask_n=mask_n, row_tile=row_tile)

    loss3d = pl.pallas_call(
        kernel,
        out_shape=jax.ShapeDtypeStruct((num_row_tiles, 1, row_tile), jnp.float32),
        grid_spec=pltpu.PrefetchScalarGridSpec(
            num_scalar_prefetch=0,
            grid=(num_row_tiles, n_tiles),
            in_specs=[
                pl.BlockSpec((row_tile, n_tile), lambda i, k: (i, k)),
                pl.BlockSpec((row_tile, n_tile), lambda i, k: (i, k)),
            ],
            out_specs=pl.BlockSpec((1, 1, row_tile), lambda i, k: (i, 0, 0)),
            scratch_shapes=[
                pltpu.VMEM((row_tile, 1), jnp.float32),
                pltpu.VMEM((row_tile, 1), jnp.float32),
                pltpu.VMEM((row_tile, 1), jnp.float32),
            ],
        ),
        compiler_params=pltpu.CompilerParams(
            dimension_semantics=("parallel", "arbitrary"),
            vmem_limit_bytes=_VMEM_LIMIT_BYTES,
        ),
    )(out2d, tgt2d)

    # Tail rows of a partial edge block hold garbage; slice them off.
    loss = loss3d.reshape(-1)[:rows]
    return loss.reshape(tuple(lead))


def _fpfn_ref(output, target):
    output = output.astype(jnp.float32)
    target = target.astype(jnp.float32)
    sum1 = jnp.sum(target, -1)
    sum2 = jnp.sum(1.0 - target, -1)
    fp = jnp.minimum(jnp.sum(output * (1.0 - target), -1) / (sum2 + 1e-6), 100.0)
    fn = jnp.minimum(jnp.sum((1.0 - output) * target, -1) / (sum1 + 1e-6), 100.0)
    return fp + fn


if __name__ == "__main__":
    key = jax.random.PRNGKey(0)
    k1, k2, k3, k4 = jax.random.split(key, 4)

    # Primary case: (batch=2, channels=4, seq=16); reduction over the last axis.
    out_a = jax.nn.sigmoid(jax.random.normal(k1, (2, 4, 16), dtype=jnp.float32))
    tgt_a = (jax.random.uniform(k2, (2, 4, 16)) > 0.5).astype(jnp.float32)
    loss_a = jax.block_until_ready(fpfn_loss(out_a, tgt_a))
    assert loss_a.shape == (2, 4)
    assert jnp.allclose(loss_a, _fpfn_ref(out_a, tgt_a), atol=1e-5, rtol=1e-5)

    # Row count (3*5=15) not a multiple of 8: exercises the partial edge block
    # (no jnp.pad in the wrapper).
    out_b = jax.nn.sigmoid(jax.random.normal(k3, (3, 5, 24), dtype=jnp.float32))
    tgt_b = (jax.random.uniform(k4, (3, 5, 24)) > 0.5).astype(jnp.float32)
    loss_b = jax.block_until_ready(fpfn_loss(out_b, tgt_b))
    assert loss_b.shape == (3, 5)
    assert jnp.allclose(loss_b, _fpfn_ref(out_b, tgt_b), atol=1e-5, rtol=1e-5)

    # bfloat16 inputs go straight into the kernel (no wrapper-side f32 copies).
    out_c = jax.nn.sigmoid(jax.random.normal(k1, (4, 8, 32))).astype(jnp.bfloat16)
    tgt_c = (jax.random.uniform(k2, (4, 8, 32)) > 0.5).astype(jnp.bfloat16)
    loss_c = jax.block_until_ready(fpfn_loss(out_c, tgt_c))
    assert loss_c.shape == (4, 8)
    assert jnp.allclose(loss_c, _fpfn_ref(out_c, tgt_c), atol=1e-3, rtol=1e-3)

    print("KERNEL_OK")
</pallas_src>

<mosaic_0001>
module attributes {stable_mosaic.version = 11 : i64} {
  func.func @_fpfn_kernel(%arg0: i32, %arg1: i32, %arg2: memref<8x16xf32, #tpu.memory_space<vmem>>, %arg3: memref<8x16xf32, #tpu.memory_space<vmem>>, %arg4: memref<1x1x8xf32, #tpu.memory_space<vmem>>, %arg5: memref<8x1xf32, #tpu.memory_space<vmem>>, %arg6: memref<8x1xf32, #tpu.memory_space<vmem>>, %arg7: memref<8x1xf32, #tpu.memory_space<vmem>>) attributes {dimension_semantics = [#tpu.dimension_semantics<parallel>, #tpu.dimension_semantics<arbitrary>], iteration_bounds = array<i64: 1, 1>, scalar_prefetch = 0 : i64, scratch_operands = 3 : i64, tpu.core_type = #tpu.core_type<tc>, window_params = [{transform_indices = @transform_0, window_bounds = array<i64: 8, 16>}, {transform_indices = @transform_1, window_bounds = array<i64: 8, 16>}, {transform_indices = @transform_2, window_bounds = array<i64: 1, 1, 8>}]} {
    %c0_i32 = arith.constant 0 : i32
    %0 = arith.cmpi eq, %arg1, %c0_i32 : i32
    %1 = arith.extui %0 : i1 to i32
    %c0_i32_0 = arith.constant 0 : i32
    %2 = arith.cmpi ne, %1, %c0_i32_0 : i32
    scf.if %2 {
      %cst_20 = arith.constant 0.000000e+00 : f32
      %24 = vector.broadcast %cst_20 : f32 to vector<8x1xf32>
      %c0_21 = arith.constant 0 : index
      %c0_22 = arith.constant 0 : index
      %25 = vector.load %arg5[%c0_21, %c0_22] : memref<8x1xf32, #tpu.memory_space<vmem>>, vector<8x1xf32>
      tpu.vector_store %arg5[%c0_21, %c0_22], %24 {strides = array<i32>} : memref<8x1xf32, #tpu.memory_space<vmem>>, vector<8x1xf32>,
      %cst_23 = arith.constant 0.000000e+00 : f32
      %26 = vector.broadcast %cst_23 : f32 to vector<8x1xf32>
      %c0_24 = arith.constant 0 : index
      %c0_25 = arith.constant 0 : index
      %27 = vector.load %arg6[%c0_24, %c0_25] : memref<8x1xf32, #tpu.memory_space<vmem>>, vector<8x1xf32>
      tpu.vector_store %arg6[%c0_24, %c0_25], %26 {strides = array<i32>} : memref<8x1xf32, #tpu.memory_space<vmem>>, vector<8x1xf32>,
      %cst_26 = arith.constant 0.000000e+00 : f32
      %28 = vector.broadcast %cst_26 : f32 to vector<8x1xf32>
      %c0_27 = arith.constant 0 : index
      %c0_28 = arith.constant 0 : index
      %29 = vector.load %arg7[%c0_27, %c0_28] : memref<8x1xf32, #tpu.memory_space<vmem>>, vector<8x1xf32>
      tpu.vector_store %arg7[%c0_27, %c0_28], %28 {strides = array<i32>} : memref<8x1xf32, #tpu.memory_space<vmem>>, vector<8x1xf32>,
    } else {
    }
    %c0 = arith.constant 0 : index
    %c0_1 = arith.constant 0 : index
    %3 = vector.load %arg2[%c0, %c0_1] : memref<8x16xf32, #tpu.memory_space<vmem>>, vector<8x16xf32>
    %c0_2 = arith.constant 0 : index
    %c0_3 = arith.constant 0 : index
    %4 = vector.load %arg3[%c0_2, %c0_3] : memref<8x16xf32, #tpu.memory_space<vmem>>, vector<8x16xf32>
    %c0_4 = arith.constant 0 : index
    %c0_5 = arith.constant 0 : index
    %5 = vector.load %arg5[%c0_4, %c0_5] : memref<8x1xf32, #tpu.memory_space<vmem>>, vector<8x1xf32>
    %cst = arith.constant dense<0.000000e+00> : vector<8xf32>
    %6 = vector.multi_reduction <add>, %3, %cst [1] : vector<8x16xf32> to vector<8xf32>
    %7 = vector.shape_cast %6 : vector<8xf32> to vector<8x1xf32>
    %8 = arith.addf %5, %7 : vector<8x1xf32>
    %c0_6 = arith.constant 0 : index
    %c0_7 = arith.constant 0 : index
    %9 = vector.load %arg5[%c0_6, %c0_7] : memref<8x1xf32, #tpu.memory_space<vmem>>, vector<8x1xf32>
    tpu.vector_store %arg5[%c0_6, %c0_7], %8 {strides = array<i32>} : memref<8x1xf32, #tpu.memory_space<vmem>>, vector<8x1xf32>,
    %c0_8 = arith.constant 0 : index
    %c0_9 = arith.constant 0 : index
    %10 = vector.load %arg6[%c0_8, %c0_9] : memref<8x1xf32, #tpu.memory_space<vmem>>, vector<8x1xf32>
    %cst_10 = arith.constant dense<0.000000e+00> : vector<8xf32>
    %11 = vector.multi_reduction <add>, %4, %cst_10 [1] : vector<8x16xf32> to vector<8xf32>
    %12 = vector.shape_cast %11 : vector<8xf32> to vector<8x1xf32>
    %13 = arith.addf %10, %12 : vector<8x1xf32>
    %c0_11 = arith.constant 0 : index
    %c0_12 = arith.constant 0 : index
    %14 = vector.load %arg6[%c0_11, %c0_12] : memref<8x1xf32, #tpu.memory_space<vmem>>, vector<8x1xf32>
    tpu.vector_store %arg6[%c0_11, %c0_12], %13 {strides = array<i32>} : memref<8x1xf32, #tpu.memory_space<vmem>>, vector<8x1xf32>,
    %c0_13 = arith.constant 0 : index
    %c0_14 = arith.constant 0 : index
    %15 = vector.load %arg7[%c0_13, %c0_14] : memref<8x1xf32, #tpu.memory_space<vmem>>, vector<8x1xf32>
    %16 = arith.mulf %3, %4 : vector<8x16xf32>
    %cst_15 = arith.constant dense<0.000000e+00> : vector<8xf32>
    %17 = vector.multi_reduction <add>, %16, %cst_15 [1] : vector<8x16xf32> to vector<8xf32>
    %18 = vector.shape_cast %17 : vector<8xf32> to vector<8x1xf32>
    %19 = arith.addf %15, %18 : vector<8x1xf32>
    %c0_16 = arith.constant 0 : index
    %c0_17 = arith.constant 0 : index
    %20 = vector.load %arg7[%c0_16, %c0_17] : memref<8x1xf32, #tpu.memory_space<vmem>>, vector<8x1xf32>
    tpu.vector_store %arg7[%c0_16, %c0_17], %19 {strides = array<i32>} : memref<8x1xf32, #tpu.memory_space<vmem>>, vector<8x1xf32>,
    %c0_i32_18 = arith.constant 0 : i32
    %21 = arith.cmpi eq, %arg1, %c0_i32_18 : i32
    %22 = arith.extui %21 : i1 to i32
    %c0_i32_19 = arith.constant 0 : i32
    %23 = arith.cmpi ne, %22, %c0_i32_19 : i32
    scf.if %23 {
      %c0_20 = arith.constant 0 : index
      %c0_21 = arith.constant 0 : index
      %24 = vector.load %arg5[%c0_20, %c0_21] : memref<8x1xf32, #tpu.memory_space<vmem>>, vector<8x1xf32>
      %c0_22 = arith.constant 0 : index
      %c0_23 = arith.constant 0 : index
      %25 = vector.load %arg6[%c0_22, %c0_23] : memref<8x1xf32, #tpu.memory_space<vmem>>, vector<8x1xf32>
      %c0_24 = arith.constant 0 : index
      %c0_25 = arith.constant 0 : index
      %26 = vector.load %arg7[%c0_24, %c0_25] : memref<8x1xf32, #tpu.memory_space<vmem>>, vector<8x1xf32>
      %cst_26 = arith.constant 1.600000e+01 : f32
      %27 = vector.broadcast %cst_26 : f32 to vector<8x1xf32>
      %28 = arith.subf %27, %25 : vector<8x1xf32>
      %29 = arith.subf %24, %26 : vector<8x1xf32>
      %cst_27 = arith.constant 9.99999997E-7 : f32
      %30 = vector.broadcast %cst_27 : f32 to vector<8x1xf32>
      %31 = arith.addf %28, %30 : vector<8x1xf32>
      %32 = arith.divf %29, %31 : vector<8x1xf32>
      %33 = arith.subf %25, %26 : vector<8x1xf32>
      %cst_28 = arith.constant 9.99999997E-7 : f32
      %34 = vector.broadcast %cst_28 : f32 to vector<8x1xf32>
      %35 = arith.addf %25, %34 : vector<8x1xf32>
      %36 = arith.divf %33, %35 : vector<8x1xf32>
      %cst_29 = arith.constant 1.000000e+02 : f32
      %37 = vector.broadcast %cst_29 : f32 to vector<8x1xf32>
      %38 = arith.minimumf %32, %37 : vector<8x1xf32>
      %cst_30 = arith.constant 1.000000e+02 : f32
      %39 = vector.broadcast %cst_30 : f32 to vector<8x1xf32>
      %40 = arith.minimumf %36, %39 : vector<8x1xf32>
      %41 = arith.addf %38, %40 : vector<8x1xf32>
      %42 = vector.shape_cast %41 : vector<8x1xf32> to vector<1x1x8xf32>
      %c0_31 = arith.constant 0 : index
      %c0_32 = arith.constant 0 : index
      %c0_33 = arith.constant 0 : index
      %43 = vector.load %arg4[%c0_31, %c0_32, %c0_33] : memref<1x1x8xf32, #tpu.memory_space<vmem>>, vector<1x1x8xf32>
      tpu.vector_store %arg4[%c0_31, %c0_32, %c0_33], %42 {strides = array<i32>} : memref<1x1x8xf32, #tpu.memory_space<vmem>>, vector<1x1x8xf32>,
    } else {
    }
    return
  }
  func.func @transform_0(%arg0: i32, %arg1: i32) -> (i32, i32) {
    %c0_i32 = arith.constant 0 : i32
    return %arg0, %arg1 : i32, i32
  }
  func.func @transform_1(%arg0: i32, %arg1: i32) -> (i32, i32) {
    %c0_i32 = arith.constant 0 : i32
    return %arg0, %arg1 : i32, i32
  }
  func.func @transform_2(%arg0: i32, %arg1: i32) -> (i32, i32, i32) {
    %c0_i32 = arith.constant 0 : i32
    %c0_i32_0 = arith.constant 0 : i32
    %c0_i32_1 = arith.constant 0 : i32
    return %arg0, %c0_i32, %c0_i32_0 : i32, i32, i32
  }
}

</mosaic_0001>

<bundles_post_ra>
// kernel: fpfn_loss.1
= control target key start
LH: loop header
LB: loop body
LE: loop exit
PB: predicated region body
PF: predicated region fallthrough
CT: control target
= control target key end

     0   :  { %7 = vsyncpa [#allocation6], 0  ;;  %s123_s9 = smov [#allocation5]   ;;  %s165_s0 = inlined_call_operand.hbm [shape: f32[8,16], index: 0, kind: input, shape index: {}]   ;;  %s166_s1 = inlined_call_operand.vmem [shape: f32[8,16], index: 1, kind: input, shape index: {}]   ;;  %s167_s2 = inlined_call_operand.vmem [shape: f32[1,1,8], index: 2, kind: output, shape index: {}]  }
   0x1   :  { %s14_s10 = sshll.u32 %s123_s9, 4  ;;  %s99_s13 = scalar_lea.hbm %s165_s0, 128  ;;  %s15_s10 = int_to_ptr.vmem [resolvable:$true] %s14_s10 }
   0x2   :  { %p100_p0 = scmp.ne.s32.totalorder %s165_s0, %s99_s13  ;;  %p103_p1 = scmp.lt.u32.totalorder %s99_s13, %s165_s0 }
   0x4   :  { %p105_p2 = pnand %p103_p1, %p100_p0 }
   0x6   :  { %108 = shalt.err (!%p105_p2)
}
   0x7   :  { %s109_s18 = scalar_lea.vmem %s15_s10, 128  ;;  %p114_p4 = scmp.lt.s32.totalorder %s15_s10, %s15_s10 }
   0x8   :  { %p110_p3 = scmp.ne.s32.totalorder %s15_s10, %s109_s18  ;;  %p115_p5 = scmp.lt.s32.totalorder %s109_s18, %s109_s18 }
   0xa   :  { %p116_p6 = por %p115_p5, %p114_p4 }
   0xc   :  { %p117_p7 = pnand %p116_p6, %p110_p3 }
   0xe   :  { %120 = shalt.err (!%p117_p7)
}
   0xf   :  { %17 = dma.hbm_to_vmem [thread:$0]  %s165_s0, 128, %s15_s10, [#allocation6]  }
  0x10   :  { %121 = dma.done.wait [#allocation6], 128  }
  0x11   :  { %122 = vsyncadd [#allocation6], 4294967168  ;;  %vm27_vm0 = vcmask 7168   ;;  %v124_v0 = vmov 0.0   ;;  %vm34_vm1 = vcmask 130048   ;;  %v32_v1 = vld [vmem:[%s166_s1] sm:$0xff]  ;;  %v76_v32 = vlaneseq }
  0x12   :  { %29 = vst.msk [vmem:[#allocation3] sm:$0xff] %vm27_vm0, %v124_v0  ;;  %28 = vst.msk [vmem:[#allocation2] sm:$0xff] %vm27_vm0, %v124_v0  ;;  %v31_v2 = vld [vmem:[#allocation5] sm:$0xff]  ;;  %v42_v3 = vsel %vm34_vm1, %v32_v1, 0.0  ;;  %v125_v7 = vmov 0   ;;  %vm83_vm2 = vcmask 57344  }
  0x13   :  { %30 = vst.msk [vmem:[#allocation4] sm:$0xff] %vm27_vm0, %v124_v0  ;;  %v48_v4 = vmul.f32 %v32_v1, %v31_v2  ;;  %43 = vadd.xlane.f32.xlu0 %v42_v3  ;;  %v35_v6 = vsel %vm34_vm1, %v31_v2, 0.0  ;;  %93 = vset.pattern.permute.xlu1 %v125_v7  ;;  %v77_v33 = vand.u32 127, %v76_v32  ;;  %v79_v34 = vshrl.u32 %v76_v32, 7 }
  0x14   :  { %94 = vset.pattern.permute.xlu0 %v125_v7 }
  0x15   :  { %v49_v5 = vsel %vm34_vm1, %v48_v4, 0.0  ;;  %v80_v35 = vsub.s32 %v77_v33, %v79_v34 }
  0x16   :  { %50 = vadd.xlane.f32.xlu1 %v49_v5 }
  0x17   :  { %36 = vadd.xlane.f32.xlu0 %v35_v6 }
  0x19   :  { %v41_v8 = vld [vmem:[#allocation3] sm:$0xff]  ;;  %v33_v13 = vld [vmem:[#allocation2] sm:$0xff] }
  0x1a   :  { %v47_v10 = vld [vmem:[#allocation4] sm:$0xff] }
  0xa0   :  { %v44_v9 = vpop.xlane.xlu0 %43 }
  0xa1   :  { %v45_v11 = vadd.f32 %v44_v9, %v41_v8 }
  0xa3   :  { %v51_v12 = vpop.xlane.xlu1 %50  ;;  %46 = vst.msk [vmem:[#allocation3] sm:$0xff] %vm27_vm0, %v45_v11 }
  0xa4   :  { %v52_v14 = vadd.f32 %v51_v12, %v47_v10  ;;  %v37_v15 = vpop.xlane.xlu0 %36 }
  0xa5   :  { %v38_v16 = vadd.f32 %v37_v15, %v33_v13 }
  0xa6   :  { %53 = vst.msk [vmem:[#allocation4] sm:$0xff] %vm27_vm0, %v52_v14 }
  0xa7   :  { %40 = vst.msk [vmem:[#allocation2] sm:$0xff] %vm27_vm0, %v38_v16 }
  0xaa   :  { %v58_v17 = vld [vmem:[#allocation3] sm:$0xff] }
  0xab   :  { %v60_v18 = vsub.f32 16.0, %v58_v17  ;;  %v66_v19 = vadd.f32 1e-06, %v58_v17 }
  0xad   :  { %v62_v20 = vadd.f32 1e-06, %v60_v18  ;;  %95 = vrcp.f32 %v66_v19  ;;  %v59_v22 = vld [vmem:[#allocation4] sm:$0xff] }
  0xae   :  { %v57_v21 = vld [vmem:[#allocation2] sm:$0xff]  ;;  %v65_v24 = vsub.f32 %v58_v17, %v59_v22 }
  0xaf   :  { %97 = vrcp.f32 %v62_v20  ;;  %v61_v23 = vsub.f32 %v57_v21, %v59_v22 }
  0xb7   :  { %v96_v25 = vpop.eup %95 }
  0xb8   :  { %v68_v26 = vmul.f32 %v96_v25, %v65_v24 }
  0xb9   :  { %v98_v27 = vpop.eup %97 }
  0xba   :  { %v64_v28 = vmul.f32 %v98_v27, %v61_v23  ;;  %v70_v30 = vmin.f32 %v68_v26, 100.0 }
  0xbc   :  { %v69_v29 = vmin.f32 %v64_v28, 100.0 }
  0xbe   :  { %v71_v31 = vadd.f32 %v70_v30, %v69_v29 }
  0xc0   :  { %74 = vperm.xlu1 %93, %v71_v31  }
 0x13f   :  { %v75_v36 = vpop.permute.xlu1 %74 }
 0x140   :  { %v81_v37 = vrot.slane %v75_v36, %v80_v35 }
 0x142   :  { %84 = vst.msk [vmem:[%s167_s2] sm:$0x1] %vm83_vm2, %v81_v37 }
 0x143   :  { %89 = vsyncpa [#allocation6], 1 }

</bundles_post_ra>
